<compile_context>
chip_gen: v5e
topology: v5e:2x2
jax: 0.10.0
libtpu: 0.0.40
codegen_flags: <defaults>
</compile_context>

<pallas_src>
import functools

import jax
import jax.numpy as jnp
from jax.experimental import pallas as pl
from jax.experimental.pallas import tpu as pltpu


NEG_INF = -1e30  # large-negative instead of -inf: avoids inf*0 / inf-inf NaNs


def _round_up(x, m):
    return ((x + m - 1) // m) * m


def _softmax_loss_kernel(emb_ref, wT_ref, labels_ref, nll_ref,
                         m_scr, l_scr, t_scr,
                         *, num_classes, block_c):
    ci = pl.program_id(1)
    last_c = pl.num_programs(1) - 1

    # ---- init running statistics at the first class tile of each batch tile
    @pl.when(ci == 0)
    def _():
        m_scr[...] = jnp.full_like(m_scr, NEG_INF)
        l_scr[...] = jnp.zeros_like(l_scr)
        t_scr[...] = jnp.zeros_like(t_scr)

    # ---- logits tile on the MXU: (block_b, E) @ (E, block_c), K x N RHS,
    #      f32 accumulation.
    scores = jax.lax.dot_general(
        emb_ref[...], wT_ref[...],
        dimension_numbers=(((1,), (0,)), ((), ())),
        preferred_element_type=jnp.float32)            # (block_b, block_c) f32

    # Global class ids of this tile (2-D broadcasted iota; 1-D iota is not
    # supported on TPU).
    class_ids = (jax.lax.broadcasted_iota(jnp.int32, scores.shape, 1)
                 + ci * block_c)
    labels = labels_ref[...]                           # (block_b, 1) int32

    def _update(s):
        # online (flash-style) log-sum-exp update
        m_prev = m_scr[...]
        m_new = jnp.maximum(m_prev, jnp.max(s, axis=-1, keepdims=True))
        l_scr[...] = (jnp.exp(m_prev - m_new) * l_scr[...]
                      + jnp.sum(jnp.exp(s - m_new), axis=-1, keepdims=True))
        m_scr[...] = m_new
        # target-logit gather: exactly one class tile contains each label
        t_scr[...] += jnp.sum(jnp.where(class_ids == labels, s, 0.0),
                              axis=-1, keepdims=True)

    if num_classes % block_c != 0:
        # Ragged last class tile: pay for the column mask only on that tile.
        @pl.when(ci != last_c)
        def _():
            _update(scores)

        @pl.when(ci == last_c)
        def _():
            _update(jnp.where(class_ids < num_classes, scores, NEG_INF))
    else:
        _update(scores)

    # ---- finalize: per-sample NLL = logsumexp - target logit
    @pl.when(ci == last_c)
    def _():
        nll_ref[...] = m_scr[...] + jnp.log(l_scr[...]) - t_scr[...]


def _physical_vmem_bytes():
    try:
        info = pltpu.get_tpu_info()
        vmem = getattr(info, "vmem_capacity_bytes", None)
        if vmem:
            return int(vmem)
    except Exception:
        pass
    return 64 * 1024 * 1024  # conservative fallback (v7x-sized)


def softmax_loss(embeddings, W, labels, *, block_b=None, block_c=None,
                 compute_dtype=jnp.bfloat16):
    """embeddings: (B, E) f32, W: (C, E) f32, labels: (B,) int -> scalar f32 loss."""
    B, E = embeddings.shape
    C, E2 = W.shape
    assert E == E2, (embeddings.shape, W.shape)

    itemsize = jnp.dtype(compute_dtype).itemsize

    # --- generation-aware VMEM budget -------------------------------------
    vmem_phys = _physical_vmem_bytes()
    # Leave headroom for compiler internal scratch / MXU result buffers:
    # ~52 MiB usable on v7x (64 MiB phys), ~112 MiB on v5e/v6e (128 MiB phys).
    vmem_limit = vmem_phys - max(12 << 20, vmem_phys // 8)

    # --- batch tile --------------------------------------------------------
    if block_b is None:
        target_b = 512 if vmem_limit < (80 << 20) else 1024
        if B <= 128:
            block_b = B                                  # full dim: always legal
        elif B <= 2 * target_b:
            # >=2 batch tiles so both v7x TensorCores get work under the
            # "parallel" axis (harmless on single-TC v5e/v6e).
            block_b = _round_up(-(-B // 2), 16)
        else:
            block_b = target_b
        # Keep the resident, double-buffered bf16 embeddings tile within ~1/3
        # of the VMEM budget (matters for very large E).
        while block_b > 64 and 2 * itemsize * block_b * E > vmem_limit // 3:
            block_b = max(8, _round_up(block_b // 2, 8))

    num_b = pl.cdiv(B, block_b)

    # --- class tile --------------------------------------------------------
    if block_c is None:
        # Budget: 70% of the limit minus the double-buffered emb tile; per
        # class column we pay a double-buffered bf16 W column plus ~2 f32
        # (block_b,)-tall intermediates (scores + exp).
        budget = int(0.70 * vmem_limit) - 2 * itemsize * block_b * E
        denom = 2 * itemsize * E + 8 * block_b
        bc_max = max(128, (budget // max(denom, 1) // 128) * 128)
        block_c = C if C <= bc_max else min(2048, bc_max)

    num_c = pl.cdiv(C, block_c)

    # --- operand layout ----------------------------------------------------
    # bf16 MXU operands (f32 accumulation in-kernel).  W is transposed ONCE
    # here to (E, C) so each streamed tile is a natural (K, N) RHS — no
    # per-tile relayout inside the kernel.
    emb_in = embeddings.astype(compute_dtype)
    wT_in = W.astype(compute_dtype).T                   # (E, C) bf16
    labels_2d = labels.astype(jnp.int32).reshape(B, 1)

    kernel = functools.partial(_softmax_loss_kernel,
                               num_classes=C, block_c=block_c)

    cost = pl.CostEstimate(
        flops=2 * B * C * E,
        transcendentals=B * C,  # exp per logit
        bytes_accessed=(emb_in.size * emb_in.dtype.itemsize
                        + int(num_b) * wT_in.size * wT_in.dtype.itemsize
                        + labels_2d.size * 4 + B * 4),
    )

    per_sample_nll = pl.pallas_call(
        kernel,
        out_shape=jax.ShapeDtypeStruct((B, 1), jnp.float32),
        grid_spec=pltpu.PrefetchScalarGridSpec(
            num_scalar_prefetch=0,
            grid=(num_b, num_c),                 # class axis innermost (reduction)
            in_specs=[
                pl.BlockSpec((block_b, E), lambda bi, ci: (bi, 0)),  # embeddings
                # W^T streamed as (E, block_c) tiles — natural MXU RHS layout.
                # TODO(synk): consider pipeline_mode=pl.Buffered(3) here if
                # profiling still shows exposed W DMA on v5e.
                pl.BlockSpec((E, block_c), lambda bi, ci: (0, ci)),
                pl.BlockSpec((block_b, 1), lambda bi, ci: (bi, 0)),  # labels
            ],
            out_specs=pl.BlockSpec((block_b, 1), lambda bi, ci: (bi, 0)),
            scratch_shapes=[
                pltpu.VMEM((block_b, 1), jnp.float32),   # running max  m
                pltpu.VMEM((block_b, 1), jnp.float32),   # running sum  l
                pltpu.VMEM((block_b, 1), jnp.float32),   # target logit t
            ],
        ),
        compiler_params=pltpu.CompilerParams(
            dimension_semantics=("parallel", "arbitrary"),
            vmem_limit_bytes=int(vmem_limit),
        ),
        cost_estimate=cost,
    )(emb_in, wT_in, labels_2d)

    # CrossEntropyLoss default 'mean' reduction (tiny XLA reduction over B).
    return jnp.mean(per_sample_nll[:, 0])


if __name__ == "__main__":
    # Small shapes consistent with the module: batch=8, embedding_size=32,
    # num_classes=16.
    batch = 8
    embedding_size = 32
    num_classes = 16

    key = jax.random.PRNGKey(0)
    k_emb, k_w, k_lbl = jax.random.split(key, 3)

    embeddings = jax.random.normal(k_emb, (batch, embedding_size),
                                   dtype=jnp.float32)

    # Deterministic xavier_normal_-style init for W (num_classes, embedding_size).
    xavier_std = (2.0 / (num_classes + embedding_size)) ** 0.5
    W = jax.random.normal(k_w, (num_classes, embedding_size),
                          dtype=jnp.float32) * xavier_std

    labels = jax.random.randint(k_lbl, (batch,), 0, num_classes,
                                dtype=jnp.int32)

    loss = softmax_loss(embeddings, W, labels)
    jax.block_until_ready(loss)

    # Reference (F.linear + CrossEntropyLoss, f32).  Kernel feeds the MXU bf16
    # operands (f32 accumulation), so allow a bf16-level tolerance.
    logits_ref = embeddings @ W.T
    logp = jax.nn.log_softmax(logits_ref, axis=-1)
    ref = -jnp.mean(logp[jnp.arange(batch), labels])
    assert jnp.allclose(loss, ref, atol=5e-2, rtol=5e-2), (loss, ref)

    print("KERNEL_OK")
</pallas_src>

<mosaic_0001>
module attributes {stable_mosaic.version = 11 : i64} {
  func.func @_softmax_loss_kernel(%arg0: i32, %arg1: i32, %arg2: memref<8x32xbf16, #tpu.memory_space<vmem>>, %arg3: memref<32x16xbf16, #tpu.memory_space<vmem>>, %arg4: memref<8x1xi32, #tpu.memory_space<vmem>>, %arg5: memref<8x1xf32, #tpu.memory_space<vmem>>, %arg6: memref<8x1xf32, #tpu.memory_space<vmem>>, %arg7: memref<8x1xf32, #tpu.memory_space<vmem>>, %arg8: memref<8x1xf32, #tpu.memory_space<vmem>>) attributes {dimension_semantics = [#tpu.dimension_semantics<parallel>, #tpu.dimension_semantics<arbitrary>], iteration_bounds = array<i64: 1, 1>, scalar_prefetch = 0 : i64, scratch_operands = 3 : i64, tpu.core_type = #tpu.core_type<tc>, window_params = [{transform_indices = @transform_0, window_bounds = array<i64: 8, 32>}, {transform_indices = @transform_1, window_bounds = array<i64: 32, 16>}, {transform_indices = @transform_2, window_bounds = array<i64: 8, 1>}, {transform_indices = @transform_3, window_bounds = array<i64: 8, 1>}]} {
    %c0_i32 = arith.constant 0 : i32
    %0 = arith.cmpi eq, %arg1, %c0_i32 : i32
    %1 = arith.extui %0 : i1 to i32
    %c0_i32_0 = arith.constant 0 : i32
    %2 = arith.cmpi ne, %1, %c0_i32_0 : i32
    scf.if %2 {
      %cst_24 = arith.constant -1.000000e+30 : f32
      %39 = vector.broadcast %cst_24 : f32 to vector<8x1xf32>
      %c0_25 = arith.constant 0 : index
      %c0_26 = arith.constant 0 : index
      %40 = vector.load %arg6[%c0_25, %c0_26] : memref<8x1xf32, #tpu.memory_space<vmem>>, vector<8x1xf32>
      tpu.vector_store %arg6[%c0_25, %c0_26], %39 {strides = array<i32>} : memref<8x1xf32, #tpu.memory_space<vmem>>, vector<8x1xf32>,
      %cst_27 = arith.constant 0.000000e+00 : f32
      %41 = vector.broadcast %cst_27 : f32 to vector<8x1xf32>
      %c0_28 = arith.constant 0 : index
      %c0_29 = arith.constant 0 : index
      %42 = vector.load %arg7[%c0_28, %c0_29] : memref<8x1xf32, #tpu.memory_space<vmem>>, vector<8x1xf32>
      tpu.vector_store %arg7[%c0_28, %c0_29], %41 {strides = array<i32>} : memref<8x1xf32, #tpu.memory_space<vmem>>, vector<8x1xf32>,
      %cst_30 = arith.constant 0.000000e+00 : f32
      %43 = vector.broadcast %cst_30 : f32 to vector<8x1xf32>
      %c0_31 = arith.constant 0 : index
      %c0_32 = arith.constant 0 : index
      %44 = vector.load %arg8[%c0_31, %c0_32] : memref<8x1xf32, #tpu.memory_space<vmem>>, vector<8x1xf32>
      tpu.vector_store %arg8[%c0_31, %c0_32], %43 {strides = array<i32>} : memref<8x1xf32, #tpu.memory_space<vmem>>, vector<8x1xf32>,
    } else {
    }
    %c0 = arith.constant 0 : index
    %c0_1 = arith.constant 0 : index
    %3 = vector.load %arg2[%c0, %c0_1] : memref<8x32xbf16, #tpu.memory_space<vmem>>, vector<8x32xbf16>
    %c0_2 = arith.constant 0 : index
    %c0_3 = arith.constant 0 : index
    %4 = vector.load %arg3[%c0_2, %c0_3] : memref<32x16xbf16, #tpu.memory_space<vmem>>, vector<32x16xbf16>
    %cst = arith.constant dense<0.000000e+00> : vector<8x16xf32>
    %5 = tpu.matmul %3, %4, %cst {dimension_numbers = #tpu.dot_dimension_numbers<[1], [0], [0], [1], [0, 0, 1, 1], [], []>} : vector<8x32xbf16>, vector<32x16xbf16>, vector<8x16xf32> -> vector<8x16xf32>
    %6 = tpu.iota {dimensions = array<i32: 1>} : vector<8x16xi32>
    %c16_i32 = arith.constant 16 : i32
    %7 = arith.muli %arg1, %c16_i32 : i32
    %8 = vector.broadcast %7 : i32 to vector<8x16xi32>
    %9 = arith.addi %6, %8 : vector<8x16xi32>
    %c0_4 = arith.constant 0 : index
    %c0_5 = arith.constant 0 : index
    %10 = vector.load %arg4[%c0_4, %c0_5] : memref<8x1xi32, #tpu.memory_space<vmem>>, vector<8x1xi32>
    %c0_6 = arith.constant 0 : index
    %c0_7 = arith.constant 0 : index
    %11 = vector.load %arg6[%c0_6, %c0_7] : memref<8x1xf32, #tpu.memory_space<vmem>>, vector<8x1xf32>
    %cst_8 = arith.constant dense<0xFF800000> : vector<8xf32>
    %12 = vector.multi_reduction <maximumf>, %5, %cst_8 [1] : vector<8x16xf32> to vector<8xf32>
    %13 = vector.shape_cast %12 : vector<8xf32> to vector<8x1xf32>
    %14 = arith.maximumf %11, %13 : vector<8x1xf32>
    %15 = arith.subf %11, %14 : vector<8x1xf32>
    %16 = math.exp %15 : vector<8x1xf32>
    %c0_9 = arith.constant 0 : index
    %c0_10 = arith.constant 0 : index
    %17 = vector.load %arg7[%c0_9, %c0_10] : memref<8x1xf32, #tpu.memory_space<vmem>>, vector<8x1xf32>
    %18 = arith.mulf %16, %17 : vector<8x1xf32>
    %19 = vector.broadcast %14 : vector<8x1xf32> to vector<8x16xf32>
    %20 = arith.subf %5, %19 : vector<8x16xf32>
    %21 = math.exp %20 : vector<8x16xf32>
    %cst_11 = arith.constant dense<0.000000e+00> : vector<8xf32>
    %22 = vector.multi_reduction <add>, %21, %cst_11 [1] : vector<8x16xf32> to vector<8xf32>
    %23 = vector.shape_cast %22 : vector<8xf32> to vector<8x1xf32>
    %24 = arith.addf %18, %23 : vector<8x1xf32>
    %c0_12 = arith.constant 0 : index
    %c0_13 = arith.constant 0 : index
    %25 = vector.load %arg7[%c0_12, %c0_13] : memref<8x1xf32, #tpu.memory_space<vmem>>, vector<8x1xf32>
    tpu.vector_store %arg7[%c0_12, %c0_13], %24 {strides = array<i32>} : memref<8x1xf32, #tpu.memory_space<vmem>>, vector<8x1xf32>,
    %c0_14 = arith.constant 0 : index
    %c0_15 = arith.constant 0 : index
    %26 = vector.load %arg6[%c0_14, %c0_15] : memref<8x1xf32, #tpu.memory_space<vmem>>, vector<8x1xf32>
    tpu.vector_store %arg6[%c0_14, %c0_15], %14 {strides = array<i32>} : memref<8x1xf32, #tpu.memory_space<vmem>>, vector<8x1xf32>,
    %c0_16 = arith.constant 0 : index
    %c0_17 = arith.constant 0 : index
    %27 = vector.load %arg8[%c0_16, %c0_17] : memref<8x1xf32, #tpu.memory_space<vmem>>, vector<8x1xf32>
    %28 = vector.broadcast %10 : vector<8x1xi32> to vector<8x16xi32>
    %29 = arith.cmpi eq, %9, %28 : vector<8x16xi32>
    %cst_18 = arith.constant 0.000000e+00 : f32
    %30 = vector.broadcast %cst_18 : f32 to vector<8x16xf32>
    %31 = arith.select %29, %5, %30 : vector<8x16xi1>, vector<8x16xf32>
    %cst_19 = arith.constant dense<0.000000e+00> : vector<8xf32>
    %32 = vector.multi_reduction <add>, %31, %cst_19 [1] : vector<8x16xf32> to vector<8xf32>
    %33 = vector.shape_cast %32 : vector<8xf32> to vector<8x1xf32>
    %34 = arith.addf %27, %33 : vector<8x1xf32>
    %c0_20 = arith.constant 0 : index
    %c0_21 = arith.constant 0 : index
    %35 = vector.load %arg8[%c0_20, %c0_21] : memref<8x1xf32, #tpu.memory_space<vmem>>, vector<8x1xf32>
    tpu.vector_store %arg8[%c0_20, %c0_21], %34 {strides = array<i32>} : memref<8x1xf32, #tpu.memory_space<vmem>>, vector<8x1xf32>,
    %c0_i32_22 = arith.constant 0 : i32
    %36 = arith.cmpi eq, %arg1, %c0_i32_22 : i32
    %37 = arith.extui %36 : i1 to i32
    %c0_i32_23 = arith.constant 0 : i32
    %38 = arith.cmpi ne, %37, %c0_i32_23 : i32
    scf.if %38 {
      %c0_24 = arith.constant 0 : index
      %c0_25 = arith.constant 0 : index
      %39 = vector.load %arg6[%c0_24, %c0_25] : memref<8x1xf32, #tpu.memory_space<vmem>>, vector<8x1xf32>
      %c0_26 = arith.constant 0 : index
      %c0_27 = arith.constant 0 : index
      %40 = vector.load %arg7[%c0_26, %c0_27] : memref<8x1xf32, #tpu.memory_space<vmem>>, vector<8x1xf32>
      %41 = math.log %40 : vector<8x1xf32>
      %42 = arith.addf %39, %41 : vector<8x1xf32>
      %c0_28 = arith.constant 0 : index
      %c0_29 = arith.constant 0 : index
      %43 = vector.load %arg8[%c0_28, %c0_29] : memref<8x1xf32, #tpu.memory_space<vmem>>, vector<8x1xf32>
      %44 = arith.subf %42, %43 : vector<8x1xf32>
      %c0_30 = arith.constant 0 : index
      %c0_31 = arith.constant 0 : index
      %45 = vector.load %arg5[%c0_30, %c0_31] : memref<8x1xf32, #tpu.memory_space<vmem>>, vector<8x1xf32>
      tpu.vector_store %arg5[%c0_30, %c0_31], %44 {strides = array<i32>} : memref<8x1xf32, #tpu.memory_space<vmem>>, vector<8x1xf32>,
    } else {
    }
    return
  }
  func.func @transform_0(%arg0: i32, %arg1: i32) -> (i32, i32) {
    %c0_i32 = arith.constant 0 : i32
    %c0_i32_0 = arith.constant 0 : i32
    return %arg0, %c0_i32 : i32, i32
  }
  func.func @transform_1(%arg0: i32, %arg1: i32) -> (i32, i32) {
    %c0_i32 = arith.constant 0 : i32
    %c0_i32_0 = arith.constant 0 : i32
    return %c0_i32, %arg1 : i32, i32
  }
  func.func @transform_2(%arg0: i32, %arg1: i32) -> (i32, i32) {
    %c0_i32 = arith.constant 0 : i32
    %c0_i32_0 = arith.constant 0 : i32
    return %arg0, %c0_i32 : i32, i32
  }
  func.func @transform_3(%arg0: i32, %arg1: i32) -> (i32, i32) {
    %c0_i32 = arith.constant 0 : i32
    %c0_i32_0 = arith.constant 0 : i32
    return %arg0, %c0_i32 : i32, i32
  }
}

</mosaic_0001>

<bundles_post_ra>
// kernel: tpu_custom_call.1
= control target key start
LH: loop header
LB: loop body
LE: loop exit
PB: predicated region body
PF: predicated region fallthrough
CT: control target
= control target key end

     0   :  { %v137_v1 = vmov 0   ;;  %vm40_vm0 = vcmask 261120   ;;  %vm19_vm1 = vcmask 7168   ;;  %v138_v5 = vmov -1e+30   ;;  %s185_s1 = inlined_call_operand.vmem [shape: bf16[32,16], index: 1, kind: input, shape index: {}]   ;;  %s186_s2 = inlined_call_operand.vmem [shape: s32[8,1], index: 2, kind: input, shape index: {}]   ;;  %s187_s0 = inlined_call_operand.vmem [shape: bf16[8,32], index: 0, kind: input, shape index: {}]   ;;  %s188_s3 = inlined_call_operand.vmem [shape: f32[8,1], index: 3, kind: output, shape index: {}]  }
   0x1   :  { %v125_v0 = vld [vmem:[%s185_s1 + $0x8] sm:$0xff]  ;;  %130 = vset.pattern.permute.xlu1 %v137_v1  ;;  %129 = vset.pattern.permute.xlu0 %v137_v1  ;;  %v62_v2 = vld [vmem:[%s186_s2] sm:$0xff]  ;;  %20 = vst.msk [vmem:[#allocation2] sm:$0xff] %vm19_vm1, %v138_v5  ;;  %v57_v6 = vlaneseq  ;;  %vm64_vm3 = vcmask 130048   ;;  %v139_v14 = vmov 0.0  }
   0x2   :  { %50 = vmatpush.bf16.msra.mxu0 %v125_v0  ;;  %v124_v3 = vld [vmem:[%s185_s1] sm:$0xff]  ;;  %91 = vperm.xlu1 %130, %v62_v2   ;;  %22 = vst.msk [vmem:[#allocation4] sm:$0xff] %vm19_vm1, %v139_v14 }
   0x3   :  { %v23_v4 = vld [vmem:[%s187_s0] sm:$0xf]  ;;  %v58_v7 = vand.u32 127, %v57_v6  ;;  %21 = vst.msk [vmem:[#allocation3] sm:$0xff] %vm19_vm1, %v139_v14 }
   0x6   :  { %51 = vmatpush.bf16.msra.mxu0 %v124_v3 }
   0x8   :  { %v63_v15 = vld [vmem:[#allocation2] sm:$0xff] }
   0x9   :  { %123 = vmatmul.msk.bf16.vlgmr.msra.gmra.mxu0 %vm40_vm0, %v23_v4  ;;  %v89_v16 = vld [vmem:[#allocation4] sm:$0xff] }
   0xa   :  { %v72_v29 = vld [vmem:[#allocation3] sm:$0xff] }
  0x74   :  { %v92_v8 = vpop.permute.xlu1 %91 }
  0x75   :  { %vm93_vm2 = vcmp.eq.s32.totalorder %v58_v7, %v92_v8 }
  0x86   :  { %v53_v9 = vpop.f32.mrf.mxu0 }
  0x87   :  { %v65_v10 = vsel %vm64_vm3, %v53_v9, -inf  ;;  %v94_v11 = vsel %vm93_vm2, %v53_v9, 0.0 }
  0x88   :  { %66 = vmax.xlane.f32.xlu0 %v65_v10  ;;  %v95_v12 = vsel %vm64_vm3, %v94_v11, 0.0 }
  0x89   :  { %96 = vadd.xlane.f32.xlu2 %v95_v12 }
  0x8e   :  { %v55_v13 = vpop.f32.mrf.mxu0 }
  0xfb   :  { %v67_v17 = vpop.xlane.xlu0 %66 }
  0xfc   :  { %v68_v18 = vmax.f32 %v63_v15, %v67_v17  ;;  %v97_v19 = vpop.xlane.xlu2 %96 }
  0xfd   :  { %v98_v20 = vadd.f32 %v97_v19, %v89_v16 }
  0xfe   :  { %v69_v21 = vsub.f32 %v63_v15, %v68_v18  ;;  %88 = vst.msk [vmem:[#allocation2] sm:$0xff] %vm19_vm1, %v68_v18  ;;  %76 = vperm.xlu0 %129, %v68_v18  }
  0xff   :  { %99 = vst.msk [vmem:[#allocation4] sm:$0xff] %vm19_vm1, %v98_v20 }
 0x100   :  { %v70_v27 = vmul.f32 1.442695, %v69_v21 }
 0x105   :  { %v103_v36 = vld [vmem:[#allocation2] sm:$0xff] }
 0x106   :  { %v108_v38 = vld [vmem:[#allocation4] sm:$0xff] }
 0x170   :  { %v77_v22 = vpop.permute.xlu0 %76 }
 0x171   :  { %v79_v23 = vsub.f32 %v53_v9, %v77_v22 }
 0x173   :  { %v80_v24 = vmul.f32 1.442695, %v79_v23 }
 0x175   :  { %131 = vpow2.f32 %v80_v24 }
 0x176   :  { %133 = vpow2.f32 %v70_v27 }
 0x17b   :  { %v132_v25 = vpop.eup %131 }
 0x17c   :  { %v82_v26 = vsel %vm64_vm3, %v132_v25, 0.0  ;;  %v134_v28 = vpop.eup %133 }
 0x17d   :  { %83 = vadd.xlane.f32.xlu1 %v82_v26  ;;  %v73_v30 = vmul.f32 %v134_v28, %v72_v29 }
 0x1f0   :  { %v84_v31 = vpop.xlane.xlu1 %83 }
 0x1f1   :  { %v85_v32 = vadd.f32 %v84_v31, %v73_v30 }
 0x1f3   :  { %87 = vst.msk [vmem:[#allocation3] sm:$0xff] %vm19_vm1, %v85_v32 }
 0x1fa   :  { %v104_v33 = vld [vmem:[#allocation3] sm:$0xff] }
 0x1fb   :  { %135 = vlog2.f32 %v104_v33 }
 0x201   :  { %v136_v34 = vpop.eup %135 }
 0x202   :  { %v106_v35 = vmul.f32 0.6931472, %v136_v34 }
 0x204   :  { %v107_v37 = vadd.f32 %v106_v35, %v103_v36 }
 0x206   :  { %v109_v39 = vsub.f32 %v107_v37, %v108_v38 }
 0x208   :  { %110 = vst.msk [vmem:[%s188_s3] sm:$0xff] %vm19_vm1, %v109_v39 }

</bundles_post_ra>
